<compile_context>
chip_gen: v7x
topology: tpu7x:2x2x1
jax: 0.10.0
libtpu: 0.0.40
codegen_flags: <defaults>
</compile_context>

<pallas_src>
import functools
import math

import jax
import jax.numpy as jnp
from jax.experimental import pallas as pl
from jax.experimental.pallas import tpu as pltpu

EPS = 1e-6
LANES = 128
MAX_BLOCK_ROWS = 512                   # 512 * 128 = 64K voxels per grid step
BLOCK_BYTE_BUDGET = 6 * 1024 * 1024    # double-buffered pred+gt input blocks


def _dice_partial_kernel(pred_ref, gt_ref, inter_ref, card_ref, *, n_valid):
    """Accumulate per-channel dice partial sums.

    pred_ref : (C, R, 128) logits block
    gt_ref   : (R, 128) int32 labels block
    inter_ref, card_ref : (C, 128) accumulators, resident across the inner axis.
    """
    s = pl.program_id(0)   # parallel slice (megacore)
    t = pl.program_id(1)   # sequential step within the slice

    @pl.when(t == 0)
    def _():
        inter_ref[...] = jnp.zeros_like(inter_ref)
        card_ref[...] = jnp.zeros_like(card_ref)

    logits = pred_ref[...].astype(jnp.float32)       # (C, R, L)
    labels = gt_ref[...].astype(jnp.int32)           # (R, L)
    C, R, L = logits.shape

    # Global voxel index of every element in this block -> validity mask for the
    # ragged tail and for fully-masked duplicate blocks (clamped index map).
    blk = s * pl.num_programs(1) + t
    start_row = blk * R
    row = jax.lax.broadcasted_iota(jnp.int32, (R, L), 0)
    lane = jax.lax.broadcasted_iota(jnp.int32, (R, L), 1)
    vox = (start_row + row) * L + lane
    valid = vox < n_valid                             # (R, L) bool
    validf = valid.astype(jnp.float32)

    # Clamp out-of-bounds garbage before exp so no inf/NaN can survive the mask.
    logits = jnp.where(valid[None], logits, 0.0)

    # Softmax over channels: C is the leading axis -> VPU elementwise + EUP exp.
    m = jnp.max(logits, axis=0, keepdims=True)        # (1, R, L)
    e = jnp.exp(logits - m)                           # (C, R, L)
    denom = jnp.sum(e, axis=0, keepdims=True)         # (1, R, L)
    inv = pl.reciprocal(denom, approx=False) * validf[None]   # mask folded in
    soft = e * inv                                    # zero on invalid voxels

    # One-hot of labels; invalid voxels get label -1 so they never match.
    labels_m = jnp.where(valid, labels, -1)
    chan = jax.lax.broadcasted_iota(jnp.int32, (C, R, L), 0)
    onehot = (chan == labels_m[None]).astype(jnp.float32)

    # Per-step reduce over the sublane (row) axis only; cross-lane reduce and
    # the tiny dice combine are deferred to the JAX epilogue.
    inter_ref[...] += jnp.sum(soft * onehot, axis=1)  # (C, L)
    card_ref[...] += jnp.sum(soft + onehot, axis=1)   # (C, L)


def dice_loss(pred, gt, classes, *, block_rows=None):
    """pred: (1, C, D, H, W) float logits; gt: (1, 1, D, H, W) int labels in [0, C)."""
    assert pred.ndim == 5 and pred.shape[0] == 1 and pred.shape[1] == classes
    C = classes
    n = math.prod(pred.shape[2:])
    assert math.prod(gt.shape) == n

    pred2 = pred.reshape(C, n)                 # free reshape (contiguous), no copy
    gt2 = gt.reshape(n).astype(jnp.int32)

    nr = pl.cdiv(n, LANES)
    n_pad = nr * LANES
    if n_pad != n:
        # TODO(synk): handle a ragged lane tail in-kernel to avoid this pad copy.
        pred2 = jnp.pad(pred2, ((0, 0), (0, n_pad - n)))
        gt2 = jnp.pad(gt2, ((0, n_pad - n),))
    pred3 = pred2.reshape(C, nr, LANES)        # (C, rows, 128)
    gt3 = gt2.reshape(nr, LANES)               # (rows, 128)

    # Rows per block: as large as comfortably fits double-buffered in VMEM.
    if block_rows is None:
        itemsize = jnp.dtype(pred3.dtype).itemsize
        bytes_per_row = 2 * (C * itemsize + 4) * LANES
        r = int(min(MAX_BLOCK_ROWS, max(8, BLOCK_BYTE_BUDGET // bytes_per_row)))
        r -= r % 8
    else:
        r = int(block_rows)
    if nr <= r:
        r = nr                                  # full-extent block (allowed even if not %8)

    nblocks = pl.cdiv(nr, r)
    S = 2 if nblocks >= 2 else 1                # parallel slices -> both TCs on megacore
    T = pl.cdiv(nblocks, S)
    last_blk = nblocks - 1

    # Clamp the block index so a slice's padding steps re-read the last valid
    # block (their contribution is fully masked to zero in-kernel).
    def pred_map(s, t):
        return (0, jnp.minimum(s * T + t, last_blk), 0)

    def gt_map(s, t):
        return (jnp.minimum(s * T + t, last_blk), 0)

    kernel = functools.partial(_dice_partial_kernel, n_valid=n)

    inter_p, card_p = pl.pallas_call(
        kernel,
        out_shape=(jax.ShapeDtypeStruct((S, C, LANES), jnp.float32),
                   jax.ShapeDtypeStruct((S, C, LANES), jnp.float32)),
        grid_spec=pltpu.PrefetchScalarGridSpec(
            num_scalar_prefetch=0,
            grid=(S, T),
            in_specs=[pl.BlockSpec((C, r, LANES), pred_map),
                      pl.BlockSpec((r, LANES), gt_map)],
            out_specs=(pl.BlockSpec((None, C, LANES), lambda s, t: (s, 0, 0)),
                       pl.BlockSpec((None, C, LANES), lambda s, t: (s, 0, 0)))),
        compiler_params=pltpu.CompilerParams(
            dimension_semantics=("parallel", "arbitrary"),
            vmem_limit_bytes=32 * 1024 * 1024),
    )(pred3, gt3)

    inter = jnp.sum(inter_p, axis=(0, 2))       # (C,)
    card = jnp.sum(card_p, axis=(0, 2))         # (C,)
    dice_score = 2.0 * inter / (card + EPS)
    return 1.0 - jnp.mean(dice_score)


def _dice_loss_ref(pred, gt, classes):
    """Pure-JAX reference mirroring the PyTorch forward."""
    gt_onehot = jax.nn.one_hot(gt.squeeze().astype(jnp.int32), classes)  # (D,H,W,C)
    gt_onehot = jnp.moveaxis(gt_onehot[None], -1, 1)                     # (1,C,D,H,W)
    input_soft = jax.nn.softmax(pred, axis=1)
    dims = (2, 3, 4)
    intersection = jnp.sum(input_soft * gt_onehot, dims)
    cardinality = jnp.sum(input_soft + gt_onehot, dims)
    dice_score = 2.0 * intersection / (cardinality + EPS)
    return 1.0 - jnp.mean(dice_score)


if __name__ == "__main__":
    key = jax.random.PRNGKey(0)

    cases = [
        # (classes, (D, H, W), block_rows)
        (4, (8, 16, 16), None),  # n = 2048: single full-extent block
        (4, (4, 5, 131), 8),     # n = 2620: lane pad + ragged rows + 2 parallel slices
        (5, (2, 4, 64), None),   # n = 512: full-extent block with rows not % 8
    ]

    for classes, (D, H, W), block_rows in cases:
        key, kp, kg = jax.random.split(key, 3)
        pred = jax.random.normal(kp, (1, classes, D, H, W), dtype=jnp.float32)
        gt = jax.random.randint(kg, (1, 1, D, H, W), 0, classes, dtype=jnp.int32)

        loss = jax.block_until_ready(dice_loss(pred, gt, classes, block_rows=block_rows))
        ref = jax.block_until_ready(_dice_loss_ref(pred, gt, classes))
        assert jnp.allclose(loss, ref, atol=1e-5, rtol=1e-5), (
            classes, (D, H, W), loss, ref)

    print("KERNEL_OK")
</pallas_src>

<mosaic_0001>
module attributes {stable_mosaic.version = 11 : i64} {
  func.func @_dice_partial_kernel(%arg0: i32, %arg1: i32, %arg2: memref<4x16x128xf32, #tpu.memory_space<vmem>>, %arg3: memref<16x128xi32, #tpu.memory_space<vmem>>, %arg4: memref<1x4x128xf32, #tpu.memory_space<vmem>>, %arg5: memref<1x4x128xf32, #tpu.memory_space<vmem>>) attributes {dimension_semantics = [#tpu.dimension_semantics<parallel>, #tpu.dimension_semantics<arbitrary>], iteration_bounds = array<i64: 1, 1>, scalar_prefetch = 0 : i64, scratch_operands = 0 : i64, tpu.core_type = #tpu.core_type<tc>, window_params = [{transform_indices = @transform_0, window_bounds = array<i64: 4, 16, 128>}, {transform_indices = @transform_1, window_bounds = array<i64: 16, 128>}, {transform_indices = @transform_2, window_bounds = array<i64: 1, 4, 128>}, {transform_indices = @transform_3, window_bounds = array<i64: 1, 4, 128>}]} {
    %c0_i32 = arith.constant 0 : i32
    %0 = arith.cmpi eq, %arg1, %c0_i32 : i32
    %1 = arith.extui %0 : i1 to i32
    %c0_i32_0 = arith.constant 0 : i32
    %2 = arith.cmpi ne, %1, %c0_i32_0 : i32
    scf.if %2 {
      %cst_21 = arith.constant 0.000000e+00 : f32
      %60 = vector.broadcast %cst_21 : f32 to vector<4x128xf32>
      %c0_22 = arith.constant 0 : index
      %c0_23 = arith.constant 0 : index
      %c0_24 = arith.constant 0 : index
      %61 = vector.load %arg4[%c0_22, %c0_23, %c0_24] : memref<1x4x128xf32, #tpu.memory_space<vmem>>, vector<1x4x128xf32>
      %62 = vector.shape_cast %61 : vector<1x4x128xf32> to vector<4x128xf32>
      %63 = vector.shape_cast %60 : vector<4x128xf32> to vector<1x4x128xf32>
      tpu.vector_store %arg4[%c0_22, %c0_23, %c0_24], %63 {strides = array<i32>} : memref<1x4x128xf32, #tpu.memory_space<vmem>>, vector<1x4x128xf32>,
      %cst_25 = arith.constant 0.000000e+00 : f32
      %64 = vector.broadcast %cst_25 : f32 to vector<4x128xf32>
      %c0_26 = arith.constant 0 : index
      %c0_27 = arith.constant 0 : index
      %c0_28 = arith.constant 0 : index
      %65 = vector.load %arg5[%c0_26, %c0_27, %c0_28] : memref<1x4x128xf32, #tpu.memory_space<vmem>>, vector<1x4x128xf32>
      %66 = vector.shape_cast %65 : vector<1x4x128xf32> to vector<4x128xf32>
      %67 = vector.shape_cast %64 : vector<4x128xf32> to vector<1x4x128xf32>
      tpu.vector_store %arg5[%c0_26, %c0_27, %c0_28], %67 {strides = array<i32>} : memref<1x4x128xf32, #tpu.memory_space<vmem>>, vector<1x4x128xf32>,
    } else {
    }
    %c0 = arith.constant 0 : index
    %c0_1 = arith.constant 0 : index
    %c0_2 = arith.constant 0 : index
    %3 = vector.load %arg2[%c0, %c0_1, %c0_2] : memref<4x16x128xf32, #tpu.memory_space<vmem>>, vector<4x16x128xf32>
    %c0_3 = arith.constant 0 : index
    %c0_4 = arith.constant 0 : index
    %4 = vector.load %arg3[%c0_3, %c0_4] : memref<16x128xi32, #tpu.memory_space<vmem>>, vector<16x128xi32>
    %c1_i32 = arith.constant 1 : i32
    %5 = arith.muli %arg0, %c1_i32 : i32
    %6 = arith.addi %5, %arg1 : i32
    %c16_i32 = arith.constant 16 : i32
    %7 = arith.muli %6, %c16_i32 : i32
    %8 = tpu.iota {dimensions = array<i32: 0>} : vector<16x128xi32>
    %9 = tpu.iota {dimensions = array<i32: 1>} : vector<16x128xi32>
    %10 = vector.broadcast %7 : i32 to vector<16x128xi32>
    %11 = arith.addi %10, %8 : vector<16x128xi32>
    %c128_i32 = arith.constant 128 : i32
    %12 = vector.broadcast %c128_i32 : i32 to vector<16x128xi32>
    %13 = arith.muli %11, %12 : vector<16x128xi32>
    %14 = arith.addi %13, %9 : vector<16x128xi32>
    %c2048_i32 = arith.constant 2048 : i32
    %15 = vector.broadcast %c2048_i32 : i32 to vector<16x128xi32>
    %16 = arith.cmpi slt, %14, %15 : vector<16x128xi32>
    %17 = arith.extui %16 : vector<16x128xi1> to vector<16x128xi32>
    %18 = arith.sitofp %17 : vector<16x128xi32> to vector<16x128xf32>
    %19 = vector.shape_cast %16 : vector<16x128xi1> to vector<1x16x128xi1>
    %cst = arith.constant 0.000000e+00 : f32
    %20 = vector.shape_cast %19 : vector<1x16x128xi1> to vector<1x16x128xi1>
    %21 = vector.broadcast %20 : vector<1x16x128xi1> to vector<4x16x128xi1>
    %22 = vector.broadcast %cst : f32 to vector<4x16x128xf32>
    %23 = arith.select %21, %3, %22 : vector<4x16x128xi1>, vector<4x16x128xf32>
    %cst_5 = arith.constant dense<0xFF800000> : vector<16x128xf32>
    %24 = vector.multi_reduction <maximumf>, %23, %cst_5 [0] : vector<4x16x128xf32> to vector<16x128xf32>
    %25 = vector.shape_cast %24 : vector<16x128xf32> to vector<1x16x128xf32>
    %26 = vector.broadcast %25 : vector<1x16x128xf32> to vector<4x16x128xf32>
    %27 = arith.subf %23, %26 : vector<4x16x128xf32>
    %28 = math.exp %27 : vector<4x16x128xf32>
    %cst_6 = arith.constant dense<0.000000e+00> : vector<16x128xf32>
    %29 = vector.multi_reduction <add>, %28, %cst_6 [0] : vector<4x16x128xf32> to vector<16x128xf32>
    %30 = vector.shape_cast %29 : vector<16x128xf32> to vector<1x16x128xf32>
    %31 = tpu.reciprocal %30 : vector<1x16x128xf32> -> vector<1x16x128xf32>
    %32 = vector.shape_cast %18 : vector<16x128xf32> to vector<1x16x128xf32>
    %33 = arith.mulf %31, %32 : vector<1x16x128xf32>
    %34 = vector.broadcast %33 : vector<1x16x128xf32> to vector<4x16x128xf32>
    %35 = arith.mulf %28, %34 : vector<4x16x128xf32>
    %c-1_i32 = arith.constant -1 : i32
    %36 = vector.broadcast %c-1_i32 : i32 to vector<16x128xi32>
    %37 = arith.select %16, %4, %36 : vector<16x128xi1>, vector<16x128xi32>
    %38 = tpu.iota {dimensions = array<i32: 0>} : vector<4x16x128xi32>
    %39 = vector.shape_cast %37 : vector<16x128xi32> to vector<1x16x128xi32>
    %40 = vector.broadcast %39 : vector<1x16x128xi32> to vector<4x16x128xi32>
    %41 = arith.cmpi eq, %38, %40 : vector<4x16x128xi32>
    %42 = arith.extui %41 : vector<4x16x128xi1> to vector<4x16x128xi32>
    %43 = arith.sitofp %42 : vector<4x16x128xi32> to vector<4x16x128xf32>
    %c0_7 = arith.constant 0 : index
    %c0_8 = arith.constant 0 : index
    %c0_9 = arith.constant 0 : index
    %44 = vector.load %arg4[%c0_7, %c0_8, %c0_9] : memref<1x4x128xf32, #tpu.memory_space<vmem>>, vector<1x4x128xf32>
    %45 = vector.shape_cast %44 : vector<1x4x128xf32> to vector<4x128xf32>
    %46 = arith.mulf %35, %43 : vector<4x16x128xf32>
    %cst_10 = arith.constant dense<0.000000e+00> : vector<4x128xf32>
    %47 = vector.multi_reduction <add>, %46, %cst_10 [1] : vector<4x16x128xf32> to vector<4x128xf32>
    %48 = arith.addf %45, %47 : vector<4x128xf32>
    %c0_11 = arith.constant 0 : index
    %c0_12 = arith.constant 0 : index
    %c0_13 = arith.constant 0 : index
    %49 = vector.load %arg4[%c0_11, %c0_12, %c0_13] : memref<1x4x128xf32, #tpu.memory_space<vmem>>, vector<1x4x128xf32>
    %50 = vector.shape_cast %49 : vector<1x4x128xf32> to vector<4x128xf32>
    %51 = vector.shape_cast %48 : vector<4x128xf32> to vector<1x4x128xf32>
    tpu.vector_store %arg4[%c0_11, %c0_12, %c0_13], %51 {strides = array<i32>} : memref<1x4x128xf32, #tpu.memory_space<vmem>>, vector<1x4x128xf32>,
    %c0_14 = arith.constant 0 : index
    %c0_15 = arith.constant 0 : index
    %c0_16 = arith.constant 0 : index
    %52 = vector.load %arg5[%c0_14, %c0_15, %c0_16] : memref<1x4x128xf32, #tpu.memory_space<vmem>>, vector<1x4x128xf32>
    %53 = vector.shape_cast %52 : vector<1x4x128xf32> to vector<4x128xf32>
    %54 = arith.addf %35, %43 : vector<4x16x128xf32>
    %cst_17 = arith.constant dense<0.000000e+00> : vector<4x128xf32>
    %55 = vector.multi_reduction <add>, %54, %cst_17 [1] : vector<4x16x128xf32> to vector<4x128xf32>
    %56 = arith.addf %53, %55 : vector<4x128xf32>
    %c0_18 = arith.constant 0 : index
    %c0_19 = arith.constant 0 : index
    %c0_20 = arith.constant 0 : index
    %57 = vector.load %arg5[%c0_18, %c0_19, %c0_20] : memref<1x4x128xf32, #tpu.memory_space<vmem>>, vector<1x4x128xf32>
    %58 = vector.shape_cast %57 : vector<1x4x128xf32> to vector<4x128xf32>
    %59 = vector.shape_cast %56 : vector<4x128xf32> to vector<1x4x128xf32>
    tpu.vector_store %arg5[%c0_18, %c0_19, %c0_20], %59 {strides = array<i32>} : memref<1x4x128xf32, #tpu.memory_space<vmem>>, vector<1x4x128xf32>,
    return
  }
  func.func @transform_0(%arg0: i32, %arg1: i32) -> (i32, i32, i32) {
    %c1_i32 = arith.constant 1 : i32
    %0 = arith.muli %arg0, %c1_i32 : i32
    %1 = arith.addi %0, %arg1 : i32
    %c0_i32 = arith.constant 0 : i32
    %2 = arith.minsi %1, %c0_i32 : i32
    %c0_i32_0 = arith.constant 0 : i32
    %c0_i32_1 = arith.constant 0 : i32
    %c0_i32_2 = arith.constant 0 : i32
    return %c0_i32_0, %2, %c0_i32_1 : i32, i32, i32
  }
  func.func @transform_1(%arg0: i32, %arg1: i32) -> (i32, i32) {
    %c1_i32 = arith.constant 1 : i32
    %0 = arith.muli %arg0, %c1_i32 : i32
    %1 = arith.addi %0, %arg1 : i32
    %c0_i32 = arith.constant 0 : i32
    %2 = arith.minsi %1, %c0_i32 : i32
    %c0_i32_0 = arith.constant 0 : i32
    %c0_i32_1 = arith.constant 0 : i32
    return %2, %c0_i32_0 : i32, i32
  }
  func.func @transform_2(%arg0: i32, %arg1: i32) -> (i32, i32, i32) {
    %c0_i32 = arith.constant 0 : i32
    %c0_i32_0 = arith.constant 0 : i32
    %c0_i32_1 = arith.constant 0 : i32
    return %arg0, %c0_i32, %c0_i32_0 : i32, i32, i32
  }
  func.func @transform_3(%arg0: i32, %arg1: i32) -> (i32, i32, i32) {
    %c0_i32 = arith.constant 0 : i32
    %c0_i32_0 = arith.constant 0 : i32
    %c0_i32_1 = arith.constant 0 : i32
    return %arg0, %c0_i32, %c0_i32_0 : i32, i32, i32
  }
}

</mosaic_0001>

<bundles_post_ra>
// kernel: tpu_custom_call.1
= control target key start
LH: loop header
LB: loop body
LE: loop exit
PB: predicated region body
PF: predicated region fallthrough
CT: control target
= control target key end

     0   :  { %9 = vsyncpa [#allocation3], 0  ;;  %s570_s0 = inlined_call_operand.hbm [shape: f32[4,16,128], index: 0, kind: input, shape index: {}]   ;;  %s571_s1 = inlined_call_operand.hbm [shape: s32[16,128], index: 1, kind: input, shape index: {}]   ;;  %s572_s2 = inlined_call_operand.hbm [shape: f32[1,4,128], index: 2, kind: output, shape index: {0}]   ;;  %s573_s3 = inlined_call_operand.hbm [shape: f32[1,4,128], index: 3, kind: output, shape index: {1}]  }
   0x1   :  { %10 = vsyncpa [#allocation6], 0 }
   0x2   :  { %11 = vsyncpa [#allocation4], 0 }
   0x3   :  { %12 = vsyncpa [#allocation9], 0  ;;  %s447_s12 = smov [#allocation2]   ;;  %s351_s16 = scalar_lea.hbm %s570_s0, 1024 }
   0x4   :  { %s24_s13 = sshll.u32 %s447_s12, 4  ;;  %p352_p0 = scmp.ne.s32.totalorder %s570_s0, %s351_s16  ;;  %s25_s13 = int_to_ptr.vmem [resolvable:$true] %s24_s13 }
   0x5   :  { %p355_p1 = scmp.lt.u32.totalorder %s351_s16, %s570_s0 }
   0x7   :  { %p357_p2 = pnand %p355_p1, %p352_p0 }
   0x9   :  { %360 = shalt.err (!%p357_p2)
}
   0xa   :  { %s361_s21 = scalar_lea.vmem %s25_s13, 1024  ;;  %p366_p4 = scmp.lt.s32.totalorder %s25_s13, %s25_s13 }
   0xb   :  { %p362_p3 = scmp.ne.s32.totalorder %s25_s13, %s361_s21  ;;  %p367_p5 = scmp.lt.s32.totalorder %s361_s21, %s361_s21 }
   0xd   :  { %p368_p6 = por %p367_p5, %p366_p4 }
   0xf   :  { %p369_p7 = pnand %p368_p6, %p362_p3 }
  0x11   :  { %372 = shalt.err (!%p369_p7)
}
  0x12   :  { %s448_s22 = smov 128   ;;  %s449_s23 = smov 8  }
  0x13   :  { %30 = dma.hbm_to_vmem [thread:$0]  %s570_s0, 1024, %s25_s13, [#allocation3], %s448_s22, %s448_s22, %s449_s23  }
  0x14   :  { %s450_s26 = smov [#allocation5]   ;;  %s373_s30 = scalar_lea.hbm %s571_s1, 256 }
  0x15   :  { %s42_s27 = sshll.u32 %s450_s26, 4  ;;  %p374_p8 = scmp.ne.s32.totalorder %s571_s1, %s373_s30  ;;  %s43_s27 = int_to_ptr.vmem [resolvable:$true] %s42_s27 }
  0x16   :  { %p377_p9 = scmp.lt.u32.totalorder %s373_s30, %s571_s1 }
  0x18   :  { %p379_p10 = pnand %p377_p9, %p374_p8 }
  0x1a   :  { %382 = shalt.err (!%p379_p10)
}
  0x1b   :  { %s383_s8 = scalar_lea.vmem %s43_s27, 256  ;;  %p388_p12 = scmp.lt.s32.totalorder %s43_s27, %s43_s27 }
  0x1c   :  { %p384_p11 = scmp.ne.s32.totalorder %s43_s27, %s383_s8  ;;  %p389_p13 = scmp.lt.s32.totalorder %s383_s8, %s383_s8 }
  0x1e   :  { %p390_p0 = por %p389_p13, %p388_p12 }
  0x20   :  { %p391_p1 = pnand %p390_p0, %p384_p11 }
  0x22   :  { %394 = shalt.err (!%p391_p1)
}
  0x23   :  { %48 = dma.hbm_to_vmem [thread:$0]  %s571_s1, 256, %s43_s27, [#allocation6], %s448_s22, %s448_s22, %s449_s23  }
  0x24   :  { %439 = dma.done.wait [#allocation3], 1024  }
  0x25   :  { %440 = vsyncadd [#allocation3], 4294966272 }
  0x26   :  { %441 = dma.done.wait [#allocation6], 256  }
  0x27   :  { %442 = vsyncadd [#allocation6], 4294967040  ;;  %v81_v0 = vlaneseq  ;;  %v451_v1 = vmov 0.0   ;;  %v69_v8 = vld [vmem:[#allocation2] sm:$0xff]  ;;  %v70_v9 = vld [vmem:[#allocation2 + $0x8] sm:$0xff]  ;;  %vm224_vm10 = vcmask 1041409  }
  0x28   :  { %67 = vst [vmem:[#allocation7] sm:$0xf] %v451_v1  ;;  %68 = vst [vmem:[#allocation8] sm:$0xf] %v451_v1  ;;  %v71_v10 = vld [vmem:[#allocation2 + $0x10] sm:$0xff]  ;;  %v72_v11 = vld [vmem:[#allocation2 + $0x18] sm:$0xff] }
  0x29   :  { %v82_v2 = vshrl.u32 %v81_v0, 7  ;;  %v85_v3 = vand.u32 127, %v81_v0  ;;  %v73_v12 = vld [vmem:[#allocation2 + $0x20] sm:$0xff]  ;;  %v74_v13 = vld [vmem:[#allocation2 + $0x28] sm:$0xff]  ;;  %v75_v15 = vld [vmem:[#allocation2 + $0x30] sm:$0xff]  ;;  %vm226_vm11 = vcmask 1042434  }
  0x2a   :  { %v76_v16 = vld [vmem:[#allocation2 + $0x38] sm:$0xff]  ;;  %v77_v61 = vld [vmem:[#allocation5] sm:$0xff]  ;;  %v78_v62 = vld [vmem:[#allocation5 + $0x8] sm:$0xff]  ;;  %vm228_vm12 = vcmask 1043459   ;;  %s452_s1 = smov [#allocation7]   ;;  %s453_s11 = smov [#allocation8]  }
  0x2b   :  { %v83_v4 = vadd.s32 8, %v82_v2  ;;  %v89_v5 = vmul.u32 128, %v82_v2  ;;  %s286_s10 = sshll.u32 %s452_s1, 4  ;;  %s296_s12 = sshll.u32 %s453_s11, 4  ;;  %s287_s10 = int_to_ptr.vmem [resolvable:$true] %s286_s10  ;;  %s297_s12 = int_to_ptr.vmem [resolvable:$true] %s296_s12 }
  0x2c   :  { %s395_s13 = scalar_lea.vmem %s287_s10, 64  ;;  %p400_p3 = scmp.lt.s32.totalorder %s287_s10, %s287_s10 }
  0x2d   :  { %v90_v6 = vmul.u32 128, %v83_v4  ;;  %v500_v7 = vadd.s32 %v89_v5, %v85_v3  ;;  %p396_p2 = scmp.ne.s32.totalorder %s287_s10, %s395_s13  ;;  %p401_p4 = scmp.lt.s32.totalorder %s395_s13, %s395_s13 }
  0x2f   :  { %v502_v14 = vadd.s32 %v90_v6, %v85_v3  ;;  %vm93_vm0 = vcmp.lt.s32.totalorder %v500_v7, 2048  ;;  %p402_p5 = por %p401_p4, %p400_p3 }
  0x30   :  { %v101_v17 = vsel %vm93_vm0, %v69_v8, 0.0  ;;  %v103_v18 = vsel %vm93_vm0, %v71_v10, 0.0  ;;  %v105_v19 = vsel %vm93_vm0, %v73_v12, 0.0  ;;  %v107_v20 = vsel %vm93_vm0, %v75_v15, 0.0 }
  0x31   :  { %vm94_vm1 = vcmp.lt.s32.totalorder %v502_v14, 2048  ;;  %v109_v25 = vmax.f32 %v101_v17, %v105_v19  ;;  %v110_v26 = vmax.f32 %v103_v18, %v107_v20  ;;  %v157_v63 = vsel %vm93_vm0, %v77_v61, 4294967295  ;;  %p403_p6 = pnand %p402_p5, %p396_p2 }
  0x32   :  { %v102_v21 = vsel %vm94_vm1, %v70_v9, 0.0  ;;  %v104_v22 = vsel %vm94_vm1, %v72_v11, 0.0  ;;  %v106_v23 = vsel %vm94_vm1, %v74_v13, 0.0  ;;  %v108_v24 = vsel %vm94_vm1, %v76_v16, 0.0 }
  0x33   :  { %v112_v27 = vmax.f32 %v102_v21, %v106_v23  ;;  %v113_v28 = vmax.f32 %v104_v22, %v108_v24  ;;  %v111_v29 = vmax.f32 %v109_v25, %v110_v26  ;;  %v158_v0 = vsel %vm94_vm1, %v78_v62, 4294967295 }
  0x34   :  { %vm159_vm2 = vcmp.eq.s32.totalorder %v157_v63, 0  ;;  %vm160_vm3 = vcmp.eq.s32.totalorder %v158_v0, 0  ;;  %v314_v2 = vsel %vm93_vm0, 1.0, %v451_v1  ;;  %vm161_vm4 = vcmp.eq.s32.totalorder %v157_v63, 1 }
  0x35   :  { %v114_v30 = vmax.f32 %v112_v27, %v113_v28  ;;  %v115_v31 = vsub.f32 %v101_v17, %v111_v29  ;;  %v117_v32 = vsub.f32 %v103_v18, %v111_v29  ;;  %v119_v33 = vsub.f32 %v105_v19, %v111_v29 }
  0x36   :  { %v121_v37 = vsub.f32 %v107_v20, %v111_v29  ;;  %vm162_vm5 = vcmp.eq.s32.totalorder %v158_v0, 1  ;;  %vm163_vm6 = vcmp.eq.s32.totalorder %v157_v63, 2  ;;  %v315_v3 = vsel %vm94_vm1, 1.0, %v451_v1 }
  0x37   :  { %v116_v34 = vsub.f32 %v102_v21, %v114_v30  ;;  %v118_v35 = vsub.f32 %v104_v22, %v114_v30  ;;  %v120_v36 = vsub.f32 %v106_v23, %v114_v30  ;;  %v123_v38 = vmul.f32 1.442695, %v115_v31 }
  0x38   :  { %v127_v39 = vmul.f32 1.442695, %v117_v32  ;;  %v122_v40 = vsub.f32 %v108_v24, %v114_v30  ;;  %v131_v43 = vmul.f32 1.442695, %v119_v33  ;;  %v135_v45 = vmul.f32 1.442695, %v121_v37 }
  0x39   :  { %v125_v41 = vmul.f32 1.442695, %v116_v34  ;;  %v129_v42 = vmul.f32 1.442695, %v118_v35  ;;  %331 = vpow2.f32 %v123_v38  ;;  %v133_v44 = vmul.f32 1.442695, %v120_v36 }
  0x3a   :  { %v137_v46 = vmul.f32 1.442695, %v122_v40  ;;  %vm164_vm7 = vcmp.eq.s32.totalorder %v158_v0, 2  ;;  %vm165_vm8 = vcmp.eq.s32.totalorder %v157_v63, 3  ;;  %vm166_vm9 = vcmp.eq.s32.totalorder %v158_v0, 3 }
  0x3b   :  { %333 = vpow2.f32 %v125_v41  ;;  %v316_v5 = vsel %vm159_vm2, 1.0, %v451_v1  ;;  %v317_v6 = vsel %vm160_vm3, 1.0, %v451_v1  ;;  %v318_v7 = vsel %vm161_vm4, 1.0, %v451_v1 }
  0x3c   :  { %335 = vpow2.f32 %v127_v39  ;;  %v319_v10 = vsel %vm162_vm5, 1.0, %v451_v1  ;;  %v320_v11 = vsel %vm163_vm6, 1.0, %v451_v1  ;;  %v321_v13 = vsel %vm164_vm7, 1.0, %v451_v1 }
  0x3d   :  { %337 = vpow2.f32 %v129_v42  ;;  %v322_v14 = vsel %vm165_vm8, 1.0, %v451_v1  ;;  %v323_v15 = vsel %vm166_vm9, 1.0, %v451_v1 }
  0x3e   :  { %339 = vpow2.f32 %v131_v43 }
  0x3f   :  { %341 = vpow2.f32 %v133_v44 }
  0x40   :  { %343 = vpow2.f32 %v135_v45 }
  0x41   :  { %345 = vpow2.f32 %v137_v46 }
  0x43   :  { %v332_v47 = vpop.eup %331 }
  0x45   :  { %v334_v48 = vpop.eup %333 }
  0x46   :  { %v336_v49 = vpop.eup %335 }
  0x47   :  { %v338_v50 = vpop.eup %337  ;;  %v139_v51 = vadd.f32 %v336_v49, %v332_v47 }
  0x48   :  { %v340_v52 = vpop.eup %339  ;;  %v142_v53 = vadd.f32 %v338_v50, %v334_v48 }
  0x49   :  { %v342_v54 = vpop.eup %341  ;;  %v140_v55 = vadd.f32 %v340_v52, %v139_v51 }
  0x4a   :  { %v344_v56 = vpop.eup %343  ;;  %v143_v57 = vadd.f32 %v342_v54, %v142_v53 }
  0x4b   :  { %v346_v58 = vpop.eup %345  ;;  %v141_v59 = vadd.f32 %v344_v56, %v140_v55 }
  0x4c   :  { %v144_v60 = vadd.f32 %v346_v58, %v143_v57 }
  0x4d   :  { %347 = vrcp.f32 %v141_v59 }
  0x4e   :  { %349 = vrcp.f32 %v144_v60 }
  0x57   :  { %v348_v4 = vpop.eup %347 }
  0x58   :  { %v350_v8 = vpop.eup %349  ;;  %v147_v9 = vmul.f32 %v348_v4, %v314_v2 }
  0x59   :  { %v148_v12 = vmul.f32 %v350_v8, %v315_v3 }
  0x5a   :  { %v149_v16 = vmul.f32 %v332_v47, %v147_v9  ;;  %v151_v17 = vmul.f32 %v336_v49, %v147_v9  ;;  %v153_v18 = vmul.f32 %v340_v52, %v147_v9  ;;  %v155_v19 = vmul.f32 %v344_v56, %v147_v9 }
  0x5b   :  { %v150_v20 = vmul.f32 %v334_v48, %v148_v12  ;;  %v152_v21 = vmul.f32 %v338_v50, %v148_v12  ;;  %v154_v22 = vmul.f32 %v342_v54, %v148_v12  ;;  %v156_v23 = vmul.f32 %v346_v58, %v148_v12 }
  0x5c   :  { %v184_v24 = vmul.f32 %v316_v5, %v149_v16  ;;  %v186_v25 = vmul.f32 %v318_v7, %v151_v17  ;;  %v188_v26 = vmul.f32 %v320_v11, %v153_v18  ;;  %v190_v27 = vmul.f32 %v322_v14, %v155_v19 }
  0x5d   :  { %v185_v28 = vmul.f32 %v317_v6, %v150_v20  ;;  %v187_v29 = vmul.f32 %v319_v10, %v152_v21  ;;  %v189_v30 = vmul.f32 %v321_v13, %v154_v22  ;;  %v191_v31 = vmul.f32 %v323_v15, %v156_v23 }
  0x5e   :  { %v234_v32 = vadd.f32 %v316_v5, %v149_v16  ;;  %v235_v33 = vadd.f32 %v317_v6, %v150_v20  ;;  %v236_v34 = vadd.f32 %v318_v7, %v151_v17  ;;  %v237_v1 = vadd.f32 %v319_v10, %v152_v21 }
  0x5f   :  { %v192_v35 = vadd.f32 %v185_v28, %v184_v24  ;;  %v199_v36 = vadd.f32 %v187_v29, %v186_v25  ;;  %v206_v37 = vadd.f32 %v189_v30, %v188_v26  ;;  %v213_v38 = vadd.f32 %v191_v31, %v190_v27  ;;  %v183_v28 = vld [vmem:[#allocation7] sm:$0xf] }
  0x60   :  { %v238_v39 = vadd.f32 %v320_v11, %v153_v18  ;;  %v239_v40 = vadd.f32 %v321_v13, %v154_v22  ;;  %v240_v41 = vadd.f32 %v322_v14, %v155_v19  ;;  %v241_v42 = vadd.f32 %v323_v15, %v156_v23 }
  0x61   :  { %v193_v43 = vrot.slane %v192_v35, 4  ;;  %v200_v44 = vrot.slane %v199_v36, 4  ;;  %v207_v45 = vrot.slane %v206_v37, 4  ;;  %v214_v46 = vrot.slane %v213_v38, 4 }
  0x62   :  { %v242_v47 = vadd.f32 %v235_v33, %v234_v32  ;;  %v249_v48 = vadd.f32 %v237_v1, %v236_v34  ;;  %v256_v49 = vadd.f32 %v239_v40, %v238_v39  ;;  %v263_v50 = vadd.f32 %v241_v42, %v240_v41 }
  0x63   :  { %v194_v51 = vadd.f32 %v193_v43, %v192_v35  ;;  %v201_v52 = vadd.f32 %v200_v44, %v199_v36  ;;  %v208_v53 = vadd.f32 %v207_v45, %v206_v37  ;;  %v215_v54 = vadd.f32 %v214_v46, %v213_v38  ;;  %v233_v36 = vld [vmem:[#allocation8] sm:$0xf] }
  0x64   :  { %v243_v55 = vrot.slane %v242_v47, 4  ;;  %v250_v56 = vrot.slane %v249_v48, 4  ;;  %v257_v57 = vrot.slane %v256_v49, 4  ;;  %v264_v58 = vrot.slane %v263_v50, 4 }
  0x65   :  { %v195_v59 = vrot.slane %v194_v51, 2  ;;  %v202_v60 = vrot.slane %v201_v52, 2  ;;  %v209_v61 = vrot.slane %v208_v53, 2  ;;  %v216_v62 = vrot.slane %v215_v54, 2 }
  0x66   :  { %v244_v63 = vadd.f32 %v243_v55, %v242_v47  ;;  %v251_v0 = vadd.f32 %v250_v56, %v249_v48  ;;  %v258_v2 = vadd.f32 %v257_v57, %v256_v49  ;;  %v265_v3 = vadd.f32 %v264_v58, %v263_v50 }
  0x67   :  { %v196_v4 = vadd.f32 %v195_v59, %v194_v51  ;;  %v203_v5 = vadd.f32 %v202_v60, %v201_v52  ;;  %v210_v6 = vadd.f32 %v209_v61, %v208_v53  ;;  %v217_v8 = vadd.f32 %v216_v62, %v215_v54 }
  0x68   :  { %v245_v9 = vrot.slane %v244_v63, 2  ;;  %v252_v7 = vrot.slane %v251_v0, 2  ;;  %v259_v10 = vrot.slane %v258_v2, 2  ;;  %v266_v11 = vrot.slane %v265_v3, 2 }
  0x69   :  { %v197_v12 = vrot.slane %v196_v4, 1  ;;  %v204_v13 = vrot.slane %v203_v5, 1  ;;  %v211_v14 = vrot.slane %v210_v6, 1  ;;  %v218_v15 = vrot.slane %v217_v8, 1 }
  0x6a   :  { %v246_v16 = vadd.f32 %v245_v9, %v244_v63  ;;  %v253_v17 = vadd.f32 %v252_v7, %v251_v0  ;;  %v260_v18 = vadd.f32 %v259_v10, %v258_v2  ;;  %v267_v19 = vadd.f32 %v266_v11, %v265_v3 }
  0x6b   :  { %v198_v20 = vadd.f32 %v197_v12, %v196_v4  ;;  %v205_v21 = vadd.f32 %v204_v13, %v203_v5  ;;  %v212_v22 = vadd.f32 %v211_v14, %v210_v6  ;;  %v219_v23 = vadd.f32 %v218_v15, %v217_v8 }
  0x6c   :  { %v247_v24 = vrot.slane %v246_v16, 1  ;;  %v254_v25 = vrot.slane %v253_v17, 1  ;;  %v261_v26 = vrot.slane %v260_v18, 1  ;;  %v268_v27 = vrot.slane %v267_v19, 1 }
  0x6d   :  { %v225_v29 = vsel %vm224_vm10, %v205_v21, %v198_v20 }
  0x6e   :  { %v227_v30 = vsel %vm226_vm11, %v212_v22, %v225_v29  ;;  %v248_v31 = vadd.f32 %v247_v24, %v246_v16  ;;  %v255_v32 = vadd.f32 %v254_v25, %v253_v17  ;;  %v262_v33 = vadd.f32 %v261_v26, %v260_v18 }
  0x6f   :  { %v229_v34 = vsel %vm228_vm12, %v219_v23, %v227_v30  ;;  %v269_v1 = vadd.f32 %v268_v27, %v267_v19 }
  0x70   :  { %v231_v35 = vadd.f32 %v229_v34, %v183_v28  ;;  %v274_v37 = vsel %vm224_vm10, %v255_v32, %v248_v31 }
  0x71   :  { %v275_v38 = vsel %vm226_vm11, %v262_v33, %v274_v37 }
  0x72   :  { %232 = vst [vmem:[#allocation7] sm:$0xf] %v231_v35  ;;  %v276_v39 = vsel %vm228_vm12, %v269_v1, %v275_v38 }
  0x73   :  { %v278_v40 = vadd.f32 %v276_v39, %v233_v36 }
  0x74   :  { %406 = shalt.err (!%p403_p6)
}
  0x75   :  { %s407_s16 = scalar_lea.hbm %s572_s2, 64 }
  0x76   :  { %p408_p7 = scmp.ne.s32.totalorder %s572_s2, %s407_s16  ;;  %p411_p8 = scmp.lt.u32.totalorder %s407_s16, %s572_s2 }
  0x78   :  { %p413_p9 = pnand %p411_p8, %p408_p7 }
  0x7a   :  { %416 = shalt.err (!%p413_p9)
}
  0x7b   :  { %289 = dma.vmem_to_hbm [thread:$0]  %s287_s10, 64, %s572_s2, [#allocation4]   ;;  %279 = vst [vmem:[#allocation8] sm:$0xf] %v278_v40 }
  0x7c   :  { %s417_s23 = scalar_lea.vmem %s297_s12, 64  ;;  %p422_p11 = scmp.lt.s32.totalorder %s297_s12, %s297_s12 }
  0x7d   :  { %p418_p10 = scmp.ne.s32.totalorder %s297_s12, %s417_s23  ;;  %p423_p12 = scmp.lt.s32.totalorder %s417_s23, %s417_s23 }
  0x7f   :  { %p424_p13 = por %p423_p12, %p422_p11 }
  0x81   :  { %p425_p0 = pnand %p424_p13, %p418_p10 }
  0x83   :  { %428 = shalt.err (!%p425_p0)
}
  0x84   :  { %s429_s26 = scalar_lea.hbm %s573_s3, 64 }
  0x85   :  { %p430_p1 = scmp.ne.s32.totalorder %s573_s3, %s429_s26  ;;  %p433_p2 = scmp.lt.u32.totalorder %s429_s26, %s573_s3 }
  0x87   :  { %p435_p3 = pnand %p433_p2, %p430_p1 }
  0x89   :  { %438 = shalt.err (!%p435_p3)
}
  0x8a   :  { %299 = dma.vmem_to_hbm [thread:$0]  %s297_s12, 64, %s573_s3, [#allocation9]  }
  0x8b   :  { %443 = dma.done.wait [#allocation4], 64  }
  0x8c   :  { %444 = vsyncadd [#allocation4], 4294967232 }
  0x8d   :  { %445 = dma.done.wait [#allocation9], 64  }
  0x8e   :  { %446 = vsyncadd [#allocation9], 4294967232 }
  0x8f   :  { %306 = vsyncpa [#allocation3], 1 }
  0x90   :  { %307 = vsyncpa [#allocation6], 1 }
  0x91   :  { %308 = vsyncpa [#allocation4], 1 }
  0x92   :  { %309 = vsyncpa [#allocation9], 1 }

</bundles_post_ra>
